<compile_context>
chip_gen: v7x
topology: tpu7x:2x2x1
jax: 0.10.0
libtpu: 0.0.40
codegen_flags: <defaults>
</compile_context>

<pallas_src>
import functools

import jax
import jax.numpy as jnp
from jax import lax
from jax.experimental import pallas as pl
from jax.experimental.pallas import tpu as pltpu


def _classify_kernel(x_ref, w1_ref, shift_ref, w2t_ref, b2_ref, out_ref, acc_ref,
                     *, inv_hw, batch_block):
    # x_ref:     (Bb, Cin, T)  batch block, one HW tile (native dtype), HW on lanes
    # w1_ref:    (Chid, Cin)   1x1-conv weight with BN scale folded in (bf16)
    # shift_ref: (Chid, 1)     folded BatchNorm shift (f32)
    # w2t_ref:   (Chid, NC)    linear weight, pre-transposed (bf16)
    # b2_ref:    (1, NC)       linear bias (f32)
    # out_ref:   (Bb, 1, NC)   softmax probabilities (lane-dense rows)
    # acc_ref:   (Bb, Chid, 1) f32 scratch: running spatial sums (avg pool)
    hw_idx = pl.program_id(1)

    @pl.when(hw_idx == 0)
    def _init():
        acc_ref[...] = jnp.zeros_like(acc_ref)

    w1 = w1_ref[...]          # (Chid, Cin) bf16
    shift = shift_ref[...]    # (Chid, 1)   f32

    for b in range(batch_block):                          # small static unroll
        # Cast to bf16 in VMEM (free VPU op) instead of a host-side cast pass.
        x_bf = x_ref[b].astype(jnp.bfloat16)              # (Cin, T)
        # 1x1 conv == channel matmul (BN scale folded into w1), bf16 MXU, f32 acc.
        y = jnp.dot(w1, x_bf, preferred_element_type=jnp.float32)   # (Chid, T)
        y = y + shift                                      # folded BN shift
        # SiLU: y * sigmoid(y), sigmoid(y) = 0.5*(tanh(y/2)+1)  (single EUP op).
        y = y * (0.5 * jnp.tanh(0.5 * y) + 0.5)
        # Partial spatial sum for AdaptiveAvgPool2d(1).
        acc_ref[b] += jnp.sum(y, axis=1, keepdims=True)    # (Chid, 1)

    @pl.when(hw_idx == pl.num_programs(1) - 1)
    def _finalize():
        w2t = w2t_ref[...]    # (Chid, NC) bf16
        b2 = b2_ref[...]      # (1, NC)    f32
        for b in range(batch_block):
            # Mean over the FULL spatial extent (not the tile size).
            pooled = (acc_ref[b] * inv_hw).astype(jnp.bfloat16)      # (Chid, 1)
            # Dropout(p=0.0) / dequantize are identities on the float path.
            # (1, NC) lane-dense logits row: contract the Chid (sublane) axis.
            logits = lax.dot_general(
                pooled, w2t,
                dimension_numbers=(((0,), (0,)), ((), ())),
                preferred_element_type=jnp.float32)                   # (1, NC)
            logits = logits + b2
            # Softmax over classes (lane axis).  Exact divide: runs once per
            # batch element, and guarantees probabilities sum to 1.
            m = jnp.max(logits, axis=1, keepdims=True)
            e = jnp.exp(logits - m)
            probs = e / jnp.sum(e, axis=1, keepdims=True)
            out_ref[b] = probs.astype(out_ref.dtype)                  # (1, NC)


def _pad_up(n, m):
    return ((n + m - 1) // m) * m


def _buf_bytes(shape, itemsize):
    """Rough VMEM footprint of one buffer with (8,128) trailing-dim padding."""
    s = list(shape)
    if len(s) >= 1:
        s[-1] = _pad_up(s[-1], 128)
    if len(s) >= 2:
        s[-2] = _pad_up(s[-2], 8)
    n = 1
    for d in s:
        n *= d
    return n * itemsize


def _vmem_estimate(bb, cin, chid, nc, t):
    est = 2 * _buf_bytes((bb, cin, t), 4)     # x tile (f32, double-buffered)
    est += 2 * _buf_bytes((chid, cin), 2)     # w1 (bf16)
    est += 2 * _buf_bytes((chid, 1), 4)       # BN shift
    est += 2 * _buf_bytes((chid, nc), 2)      # w2^T (bf16)
    est += 2 * _buf_bytes((1, nc), 4)         # b2
    est += 2 * _buf_bytes((bb, 1, nc), 4)     # output block
    est += _buf_bytes((bb, chid, 1), 4)       # pooled-sum scratch
    est += 2 * _buf_bytes((chid, t), 4)       # (Chid, T) f32 intermediate + temps
    return est


def _choose_hw_tile(hw, cap, fits):
    """Largest lane-aligned T dividing hw with T <= cap and fits(T); else 128/hw."""
    if hw % 128 != 0:
        return hw                              # ragged spatial extent: one tile
    cap = max(128, min(cap, hw))
    cands = [t for t in range(128, hw + 1, 128) if hw % t == 0 and t <= cap]
    if not cands:
        cands = [128]
    for t in sorted(cands, reverse=True):
        if fits(t):
            return t
    return cands[0]


def classify_forward(x_nchw, params, eps=1e-5, max_hw_tile=2048,
                     vmem_budget_bytes=40 * 1024 * 1024):
    B, Cin, H, W = x_nchw.shape
    HW = H * W

    # NCHW -> (B, Cin, H*W): pure reshape, no transpose.  No dtype cast here —
    # the kernel casts to bf16 in VMEM, halving HBM traffic on the big tensor.
    x = x_nchw.reshape(B, Cin, HW)

    w_conv = params["conv_w"].astype(jnp.float32)             # (Chid, Cin, 1, 1)
    Chid = w_conv.shape[0]

    gamma = params["bn_gamma"].astype(jnp.float32)
    beta = params["bn_beta"].astype(jnp.float32)
    mean = params["bn_mean"].astype(jnp.float32)
    var = params["bn_var"].astype(jnp.float32)
    inv_std = 1.0 / jnp.sqrt(var + eps)
    scale = gamma * inv_std                                    # (Chid,)

    # Fold BN scale into the conv weight in f32, THEN cast to bf16.
    w1 = (w_conv.reshape(Chid, Cin) * scale[:, None]).astype(jnp.bfloat16)
    shift = (beta - mean * scale).reshape(Chid, 1).astype(jnp.float32)

    lin_w = params["lin_w"].astype(jnp.float32)                # (NC, Chid)
    NC = lin_w.shape[0]
    # Pre-transposed bf16 linear weight: half the resident VMEM and a
    # lane-dense logits row in the kernel.
    w2t = lin_w.T.astype(jnp.bfloat16)                         # (Chid, NC)
    b2 = params["lin_b"].reshape(1, NC).astype(jnp.float32)

    # --- size tiles under a v7x-safe VMEM budget (also fine on v5e/v6e) ---
    def fits_t(t):
        return _vmem_estimate(1, Cin, Chid, NC, t) <= vmem_budget_bytes

    T = _choose_hw_tile(HW, max_hw_tile, fits_t)
    n_hw = HW // T

    # Block several batch elements per grid step when HW fits one tile
    # (amortizes per-step pipeline overhead for the common Classify case).
    Bb = 1
    if n_hw == 1:
        for d in range(2, min(B, 8) + 1):
            if B % d == 0 and _vmem_estimate(d, Cin, Chid, NC, T) <= vmem_budget_bytes:
                Bb = d

    est = _vmem_estimate(Bb, Cin, Chid, NC, T)
    vmem_limit = int(min(max(est + (8 << 20), 32 << 20), 48 << 20))

    kernel = functools.partial(_classify_kernel, inv_hw=1.0 / HW, batch_block=Bb)

    out = pl.pallas_call(
        kernel,
        out_shape=jax.ShapeDtypeStruct((B, 1, NC), jnp.float32),
        grid_spec=pltpu.PrefetchScalarGridSpec(
            num_scalar_prefetch=0,
            grid=(B // Bb, n_hw),
            in_specs=[
                # x DMA could use pipeline_mode=pl.Buffered(3) when mem-bound;
                # kept at the default depth for portability / VMEM headroom.
                pl.BlockSpec((Bb, Cin, T), lambda b, t: (b, 0, t)),
                pl.BlockSpec((Chid, Cin), lambda b, t: (0, 0)),
                pl.BlockSpec((Chid, 1), lambda b, t: (0, 0)),
                pl.BlockSpec((Chid, NC), lambda b, t: (0, 0)),
                pl.BlockSpec((1, NC), lambda b, t: (0, 0)),
            ],
            out_specs=pl.BlockSpec((Bb, 1, NC), lambda b, t: (b, 0, 0)),
            scratch_shapes=[pltpu.VMEM((Bb, Chid, 1), jnp.float32)],
        ),
        compiler_params=pltpu.CompilerParams(
            # On v7x, pltpu.CORE_PARALLEL on the batch axis would shard across
            # both TensorCores; "parallel" is kept for cross-generation safety.
            dimension_semantics=("parallel", "arbitrary"),
            vmem_limit_bytes=vmem_limit,
        ),
    )(x, w1, shift, w2t, b2)

    return out.reshape(B, NC)


def classify_reference(x_nchw, params, eps=1e-5):
    """Pure-JAX f32 reference of the PyTorch module's eval forward."""
    x = x_nchw.astype(jnp.float32)
    Cin = x.shape[1]
    w = params["conv_w"].astype(jnp.float32).reshape(-1, Cin)            # (Chid, Cin)
    y = jnp.einsum("oc,bchw->bohw", w, x)
    inv_std = 1.0 / jnp.sqrt(params["bn_var"].astype(jnp.float32) + eps)
    scale = params["bn_gamma"].astype(jnp.float32) * inv_std
    shift = params["bn_beta"].astype(jnp.float32) - params["bn_mean"].astype(jnp.float32) * scale
    y = y * scale[None, :, None, None] + shift[None, :, None, None]
    y = y * jax.nn.sigmoid(y)                                            # SiLU
    pooled = jnp.mean(y, axis=(2, 3))                                    # (B, Chid)
    logits = pooled @ params["lin_w"].astype(jnp.float32).T + params["lin_b"].astype(jnp.float32)
    return jax.nn.softmax(logits, axis=1)


if __name__ == "__main__":
    key = jax.random.PRNGKey(0)
    B, Cin, H, W = 2, 4, 16, 16
    Chid, NC = 32, 8

    ks = jax.random.split(key, 8)
    x = jax.random.normal(ks[0], (B, Cin, H, W), dtype=jnp.float32)

    params = {
        "conv_w":  0.1 * jax.random.normal(ks[1], (Chid, Cin, 1, 1), jnp.float32),
        "bn_gamma": 1.0 + 0.1 * jax.random.normal(ks[2], (Chid,), jnp.float32),
        "bn_beta":  0.1 * jax.random.normal(ks[3], (Chid,), jnp.float32),
        "bn_mean":  0.05 * jax.random.normal(ks[4], (Chid,), jnp.float32),
        "bn_var":   jnp.abs(jax.random.normal(ks[5], (Chid,), jnp.float32)) + 0.5,
        "lin_w":    0.1 * jax.random.normal(ks[6], (NC, Chid), jnp.float32),
        "lin_b":    jnp.linspace(-0.1, 0.1, NC, dtype=jnp.float32),
    }

    ref = classify_reference(x, params)

    # Path 1: max_hw_tile=128 -> two HW tiles, exercises the pooled-sum accumulator.
    out_tiled = jax.block_until_ready(classify_forward(x, params, max_hw_tile=128))
    # Path 2: default -> single HW tile, exercises batch blocking (Bb=2).
    out_block = jax.block_until_ready(classify_forward(x, params))

    for out in (out_tiled, out_block):
        assert out.shape == (B, NC)
        assert jnp.allclose(jnp.sum(out, axis=-1), 1.0, atol=1e-4), jnp.sum(out, axis=-1)
        assert jnp.allclose(out, ref, atol=2e-2, rtol=2e-2), (
            f"max abs err {jnp.max(jnp.abs(out - ref))}")

    print("KERNEL_OK")
</pallas_src>

<mosaic_0001>
module attributes {stable_mosaic.version = 11 : i64} {
  func.func @_classify_kernel(%arg0: i32, %arg1: i32, %arg2: memref<1x4x128xf32, #tpu.memory_space<vmem>>, %arg3: memref<32x4xbf16, #tpu.memory_space<vmem>>, %arg4: memref<32x1xf32, #tpu.memory_space<vmem>>, %arg5: memref<32x8xbf16, #tpu.memory_space<vmem>>, %arg6: memref<1x8xf32, #tpu.memory_space<vmem>>, %arg7: memref<1x1x8xf32, #tpu.memory_space<vmem>>, %arg8: memref<1x32x1xf32, #tpu.memory_space<vmem>>) attributes {dimension_semantics = [#tpu.dimension_semantics<parallel>, #tpu.dimension_semantics<arbitrary>], iteration_bounds = array<i64: 2, 2>, scalar_prefetch = 0 : i64, scratch_operands = 1 : i64, tpu.core_type = #tpu.core_type<tc>, window_params = [{transform_indices = @transform_0, window_bounds = array<i64: 1, 4, 128>}, {pipeline_mode = #tpu.pipeline_mode<synchronous>, transform_indices = @transform_1, window_bounds = array<i64: 32, 4>}, {pipeline_mode = #tpu.pipeline_mode<synchronous>, transform_indices = @transform_2, window_bounds = array<i64: 32, 1>}, {pipeline_mode = #tpu.pipeline_mode<synchronous>, transform_indices = @transform_3, window_bounds = array<i64: 32, 8>}, {pipeline_mode = #tpu.pipeline_mode<synchronous>, transform_indices = @transform_4, window_bounds = array<i64: 1, 8>}, {transform_indices = @transform_5, window_bounds = array<i64: 1, 1, 8>}]} {
    %c0_i32 = arith.constant 0 : i32
    %0 = arith.cmpi eq, %arg1, %c0_i32 : i32
    %1 = arith.extui %0 : i1 to i32
    %c0_i32_0 = arith.constant 0 : i32
    %2 = arith.cmpi ne, %1, %c0_i32_0 : i32
    scf.if %2 {
      %cst_18 = arith.constant 0.000000e+00 : f32
      %30 = vector.broadcast %cst_18 : f32 to vector<1x32x1xf32>
      %c0_19 = arith.constant 0 : index
      %c0_20 = arith.constant 0 : index
      %c0_21 = arith.constant 0 : index
      %31 = vector.load %arg8[%c0_19, %c0_20, %c0_21] : memref<1x32x1xf32, #tpu.memory_space<vmem>>, vector<1x32x1xf32>
      tpu.vector_store %arg8[%c0_19, %c0_20, %c0_21], %30 {strides = array<i32>} : memref<1x32x1xf32, #tpu.memory_space<vmem>>, vector<1x32x1xf32>,
    } else {
    }
    %c0 = arith.constant 0 : index
    %c0_1 = arith.constant 0 : index
    %3 = vector.load %arg3[%c0, %c0_1] : memref<32x4xbf16, #tpu.memory_space<vmem>>, vector<32x4xbf16>
    %c0_2 = arith.constant 0 : index
    %c0_3 = arith.constant 0 : index
    %4 = vector.load %arg4[%c0_2, %c0_3] : memref<32x1xf32, #tpu.memory_space<vmem>>, vector<32x1xf32>
    %c0_4 = arith.constant 0 : index
    %c0_5 = arith.constant 0 : index
    %c0_6 = arith.constant 0 : index
    %5 = vector.load %arg2[%c0_4, %c0_5, %c0_6] : memref<1x4x128xf32, #tpu.memory_space<vmem>>, vector<1x4x128xf32>
    %6 = vector.shape_cast %5 : vector<1x4x128xf32> to vector<4x128xf32>
    %7 = arith.truncf %6 : vector<4x128xf32> to vector<4x128xbf16>
    %cst = arith.constant dense<0.000000e+00> : vector<32x128xf32>
    %8 = tpu.matmul %3, %7, %cst {dimension_numbers = #tpu.dot_dimension_numbers<[1], [0], [0], [1], [0, 0, 1, 1], [], []>} : vector<32x4xbf16>, vector<4x128xbf16>, vector<32x128xf32> -> vector<32x128xf32>
    %9 = vector.broadcast %4 : vector<32x1xf32> to vector<32x128xf32>
    %10 = arith.addf %8, %9 : vector<32x128xf32>
    %cst_7 = arith.constant 5.000000e-01 : f32
    %11 = vector.broadcast %cst_7 : f32 to vector<32x128xf32>
    %12 = arith.mulf %11, %10 : vector<32x128xf32>
    %13 = math.tanh %12 : vector<32x128xf32>
    %cst_8 = arith.constant 5.000000e-01 : f32
    %14 = vector.broadcast %cst_8 : f32 to vector<32x128xf32>
    %15 = arith.mulf %14, %13 : vector<32x128xf32>
    %cst_9 = arith.constant 5.000000e-01 : f32
    %16 = vector.broadcast %cst_9 : f32 to vector<32x128xf32>
    %17 = arith.addf %15, %16 : vector<32x128xf32>
    %18 = arith.mulf %10, %17 : vector<32x128xf32>
    %c0_10 = arith.constant 0 : index
    %c0_11 = arith.constant 0 : index
    %c0_12 = arith.constant 0 : index
    %19 = vector.load %arg8[%c0_10, %c0_11, %c0_12] : memref<1x32x1xf32, #tpu.memory_space<vmem>>, vector<1x32x1xf32>
    %20 = vector.shape_cast %19 : vector<1x32x1xf32> to vector<32x1xf32>
    %cst_13 = arith.constant dense<0.000000e+00> : vector<32xf32>
    %21 = vector.multi_reduction <add>, %18, %cst_13 [1] : vector<32x128xf32> to vector<32xf32>
    %22 = vector.shape_cast %21 : vector<32xf32> to vector<32x1xf32>
    %23 = arith.addf %20, %22 : vector<32x1xf32>
    %c0_14 = arith.constant 0 : index
    %c0_15 = arith.constant 0 : index
    %c0_16 = arith.constant 0 : index
    %24 = vector.load %arg8[%c0_14, %c0_15, %c0_16] : memref<1x32x1xf32, #tpu.memory_space<vmem>>, vector<1x32x1xf32>
    %25 = vector.shape_cast %24 : vector<1x32x1xf32> to vector<32x1xf32>
    %26 = vector.shape_cast %23 : vector<32x1xf32> to vector<1x32x1xf32>
    tpu.vector_store %arg8[%c0_14, %c0_15, %c0_16], %26 {strides = array<i32>} : memref<1x32x1xf32, #tpu.memory_space<vmem>>, vector<1x32x1xf32>,
    %c1_i32 = arith.constant 1 : i32
    %27 = arith.cmpi eq, %arg1, %c1_i32 : i32
    %28 = arith.extui %27 : i1 to i32
    %c0_i32_17 = arith.constant 0 : i32
    %29 = arith.cmpi ne, %28, %c0_i32_17 : i32
    scf.if %29 {
      %c0_18 = arith.constant 0 : index
      %c0_19 = arith.constant 0 : index
      %30 = vector.load %arg5[%c0_18, %c0_19] : memref<32x8xbf16, #tpu.memory_space<vmem>>, vector<32x8xbf16>
      %c0_20 = arith.constant 0 : index
      %c0_21 = arith.constant 0 : index
      %31 = vector.load %arg6[%c0_20, %c0_21] : memref<1x8xf32, #tpu.memory_space<vmem>>, vector<1x8xf32>
      %c0_22 = arith.constant 0 : index
      %c0_23 = arith.constant 0 : index
      %c0_24 = arith.constant 0 : index
      %32 = vector.load %arg8[%c0_22, %c0_23, %c0_24] : memref<1x32x1xf32, #tpu.memory_space<vmem>>, vector<1x32x1xf32>
      %33 = vector.shape_cast %32 : vector<1x32x1xf32> to vector<32x1xf32>
      %cst_25 = arith.constant 3.906250e-03 : f32
      %34 = vector.broadcast %cst_25 : f32 to vector<32x1xf32>
      %35 = arith.mulf %33, %34 : vector<32x1xf32>
      %36 = arith.truncf %35 : vector<32x1xf32> to vector<32x1xbf16>
      %cst_26 = arith.constant dense<0.000000e+00> : vector<1x8xf32>
      %37 = tpu.matmul %36, %30, %cst_26 {dimension_numbers = #tpu.dot_dimension_numbers<[0], [0], [1], [1], [0, 1, 1, 1], [], []>} : vector<32x1xbf16>, vector<32x8xbf16>, vector<1x8xf32> -> vector<1x8xf32>
      %38 = arith.addf %37, %31 : vector<1x8xf32>
      %cst_27 = arith.constant dense<0xFF800000> : vector<1xf32>
      %39 = vector.multi_reduction <maximumf>, %38, %cst_27 [1] : vector<1x8xf32> to vector<1xf32>
      %40 = vector.shape_cast %39 : vector<1xf32> to vector<1x1xf32>
      %41 = vector.broadcast %40 : vector<1x1xf32> to vector<1x8xf32>
      %42 = arith.subf %38, %41 : vector<1x8xf32>
      %43 = math.exp %42 : vector<1x8xf32>
      %cst_28 = arith.constant dense<0.000000e+00> : vector<1xf32>
      %44 = vector.multi_reduction <add>, %43, %cst_28 [1] : vector<1x8xf32> to vector<1xf32>
      %45 = vector.shape_cast %44 : vector<1xf32> to vector<1x1xf32>
      %46 = vector.broadcast %45 : vector<1x1xf32> to vector<1x8xf32>
      %47 = arith.divf %43, %46 : vector<1x8xf32>
      %c0_29 = arith.constant 0 : index
      %c0_30 = arith.constant 0 : index
      %c0_31 = arith.constant 0 : index
      %48 = vector.load %arg7[%c0_29, %c0_30, %c0_31] : memref<1x1x8xf32, #tpu.memory_space<vmem>>, vector<1x1x8xf32>
      %49 = vector.shape_cast %48 : vector<1x1x8xf32> to vector<1x8xf32>
      %50 = vector.shape_cast %47 : vector<1x8xf32> to vector<1x1x8xf32>
      tpu.vector_store %arg7[%c0_29, %c0_30, %c0_31], %50 {strides = array<i32>} : memref<1x1x8xf32, #tpu.memory_space<vmem>>, vector<1x1x8xf32>,
    } else {
    }
    return
  }
  func.func @transform_0(%arg0: i32, %arg1: i32) -> (i32, i32, i32) {
    %c0_i32 = arith.constant 0 : i32
    %c0_i32_0 = arith.constant 0 : i32
    return %arg0, %c0_i32, %arg1 : i32, i32, i32
  }
  func.func @transform_1(%arg0: i32, %arg1: i32) -> (i32, i32) {
    %c0_i32 = arith.constant 0 : i32
    %c0_i32_0 = arith.constant 0 : i32
    %c0_i32_1 = arith.constant 0 : i32
    return %c0_i32, %c0_i32_0 : i32, i32
  }
  func.func @transform_2(%arg0: i32, %arg1: i32) -> (i32, i32) {
    %c0_i32 = arith.constant 0 : i32
    %c0_i32_0 = arith.constant 0 : i32
    %c0_i32_1 = arith.constant 0 : i32
    return %c0_i32, %c0_i32_0 : i32, i32
  }
  func.func @transform_3(%arg0: i32, %arg1: i32) -> (i32, i32) {
    %c0_i32 = arith.constant 0 : i32
    %c0_i32_0 = arith.constant 0 : i32
    %c0_i32_1 = arith.constant 0 : i32
    return %c0_i32, %c0_i32_0 : i32, i32
  }
  func.func @transform_4(%arg0: i32, %arg1: i32) -> (i32, i32) {
    %c0_i32 = arith.constant 0 : i32
    %c0_i32_0 = arith.constant 0 : i32
    %c0_i32_1 = arith.constant 0 : i32
    return %c0_i32, %c0_i32_0 : i32, i32
  }
  func.func @transform_5(%arg0: i32, %arg1: i32) -> (i32, i32, i32) {
    %c0_i32 = arith.constant 0 : i32
    %c0_i32_0 = arith.constant 0 : i32
    %c0_i32_1 = arith.constant 0 : i32
    return %arg0, %c0_i32, %c0_i32_0 : i32, i32, i32
  }
}

</mosaic_0001>

<bundles_post_ra>
// kernel: tpu_custom_call.1
= control target key start
LH: loop header
LB: loop body
LE: loop exit
PB: predicated region body
PF: predicated region fallthrough
CT: control target
= control target key end

     0   :  { %10 = vsyncpa [#allocation4], 0  ;;  %s1018_s0 = inlined_call_operand.vmem [shape: f32[2,4,256], index: 0, kind: input, shape index: {}]   ;;  %s1019_s1 = inlined_call_operand.vmem [shape: bf16[32,4], index: 1, kind: input, shape index: {}]   ;;  %s1020_s2 = inlined_call_operand.vmem [shape: f32[32,1], index: 2, kind: input, shape index: {}]   ;;  %s1021_s3 = inlined_call_operand.vmem [shape: bf16[32,8], index: 3, kind: input, shape index: {}]   ;;  %s1022_s4 = inlined_call_operand.vmem [shape: f32[1,8], index: 4, kind: input, shape index: {}]   ;;  %s1023_s5 = inlined_call_operand.hbm [shape: f32[2,1,8], index: 5, kind: output, shape index: {}]  }
   0x1   :  { %12 = vsyncpa [#allocation4 + $0x1], 0  ;;  %s850_s18 = smov 0   ;;  %s852_s19 = smov 0  }
   0x2   :  { %s854_s20 = smov 0   ;;  %s856_s21 = smov 0  }
   0x3   :  { %s858_s22 = smov 0   ;;  %s860_s23 = smov 0  }
   0x4   :  { %s862_s24 = smov 0   ;;  %s864_s25 = smov 0  }
   0x5 LB: > { %s585_s26 = sadd.s32 4294967295, %s813_s25   ;;  %s586_s27 = sadd.s32 4294967294, %s813_s25   ;;  %s813_s25 = sphi %s864_s25, %s18_s25   ;;  %s809_s24 = sphi %s862_s24, %s1032_s24   ;;  %s805_s23 = sphi %s860_s23, %s1031_s23   ;;  %s801_s22 = sphi %s858_s22, %s1030_s22   ;;  %s797_s21 = sphi %s856_s21, %s1029_s21   ;;  %s793_s20 = sphi %s854_s20, %s1028_s20   ;;  %s789_s19 = sphi %s852_s19, %s1027_s19   ;;  %s785_s18 = sphi %s850_s18, %s1026_s18  }
   0x6   : > { %s27_s28 = sadd.s32 1, %s805_s23  ;;  %s30_s29 = sadd.s32 1, %s809_s24 }
   0x7   : > { %p28_p0 = scmp.ge.s32.totalorder %s27_s28, 2  ;;  %p159_p1 = scmp.ne.s32.totalorder %s793_s20, %s789_s19 }
   0x8   : > { %p160_p2 = scmp.eq.s32.totalorder %s585_s26, 3  ;;  %p165_p4 = scmp.ne.s32.totalorder %s789_s19, %s785_s18 }
   0x9   : > { %s1034_s28 = smov (%p28_p0, %s27_s28), 0  ;;  %s1036_s29 = smov (!%p28_p0, %s30_s29), %s809_s24 }
   0xa   : > { %p899_p3 = por %p160_p2, %p159_p1  ;;  %p32_p5 = scmp.ge.s32.totalorder %s1036_s29, 2 }
   0xb   : > { %p166_p6 = scmp.eq.s32.totalorder %s586_s27, 3  ;;  %p589_p7 = scmp.ge.s32.totalorder %s813_s25, 1 }
   0xc   : > { %p207_p8 = scmp.lt.s32.totalorder %s813_s25, 5  ;;  %s1038_s29 = smov (%p32_p5, %s1036_s29), 0 }
   0xd   : > { %p909_p9 = por %p166_p6, %p165_p4  ;;  %s146_s7 = ssub.s32 %s809_s24, %s1038_s29 }
   0xe   : > { %p208_p10 = pnand %p589_p7, %p207_p8  ;;  %s149_s8 = sadd.s32 1, %s793_s20 }
   0xf   : > { %p147_p11 = scmp.eq.s32.totalorder %s146_s7, 0  ;;  %s235_s10 = sand.u32 (!%p208_p10), 1, %s789_s19  }
  0x10   : > { %211 = sbr.rel (%p208_p10) target bundleno = 1089 (0x441), region = 40  ;;  %p237_p12 = scmp.lt.s32.totalorder (!%p208_p10), %s801_s22, 1 }
  0x11   : > { %s917_s9 = scalar_select %p147_p11, %s793_s20, %s149_s8  }
  0x12   : > { %p239_p13 = scmp.lt.s32.totalorder (!%p208_p10), %s797_s21, 1  ;;  %s929_s27 = scalar_lea.vmem (!%p208_p10), [#allocation3], %s235_s10 }
  0x13   : > { %p592_p0 = scmp.ne.s32.totalorder (!%p208_p10), %s797_s21, 0 }
  0x17   : > { %s238_s11 = scalar_select %p237_p12, %s801_s22, 1 }
  0x18   : > { %s240_s12 = scalar_select %p239_p13, %s797_s21, 1 }
  0x19   : > { %s590_s13 = sshll.u32 %s238_s11, 1  ;;  %249 = sbr.rel (%p592_p0) target bundleno = 32 (0x20), region = 44  ;;  %vm250_vm0 = vcmask (!%p592_p0), 7168   ;;  %v815_v0 = vmov (!%p592_p0), 0.0  }
  0x1a   : > { %s242_s14 = sadd.s32 %s590_s13, %s240_s12  ;;  %251 = vst.msk [vmem:[#allocation2] sm:$0xff] (!%p592_p0), %vm250_vm0, %v815_v0  ;;  %252 = vst.msk [vmem:[#allocation2 + $0x8] sm:$0xff] (!%p592_p0), %vm250_vm0, %v815_v0 }
  0x1b   : > { %s591_s15 = sshll.u32 %s242_s14, 2  ;;  %253 = vst.msk [vmem:[#allocation2 + $0x10] sm:$0xff] (!%p592_p0), %vm250_vm0, %v815_v0  ;;  %254 = vst.msk [vmem:[#allocation2 + $0x18] sm:$0xff] (!%p592_p0), %vm250_vm0, %v815_v0 }
  0x1c   : > { %s244_s26 = scalar_lea.vmem %s1018_s0, %s591_s15 }
  0x20 PF: > { %v263_v1 = vld [vmem:[%s244_s26] sm:$0xf]  ;;  %vm302_vm1 = vcmask 1041408   ;;  %vm295_vm2 = vcmask 31744   ;;  %v261_v5 = vld [vmem:[%s1020_s2 + $0x10] sm:$0xff]  ;;  %v704_v7 = vld [vmem:[%s1019_s1 + $0x8] sm:$0xff]  }
  0x21   : > { %v703_v2 = vld [vmem:[%s1019_s1] sm:$0xff]   ;;  %v264_v3 = vpack.c.bf16 %v263_v1, %v263_v1  ;;  %v816_v8 = vmov 0   ;;  %v260_v9 = vld [vmem:[%s1020_s2 + $0x8] sm:$0xff]  ;;  %v262_v10 = vld [vmem:[%s1020_s2 + $0x18] sm:$0xff]  ;;  %vm391_vm3 = vcmask 7168   ;;  %p597_p1 = scmp.ne.s32.totalorder %s797_s21, 1 }
  0x22   : > { %612 = vmatprep.mubr.msk.bf16.mxu0 %vm295_vm2, %v703_v2  ;;  %v259_v4 = vld [vmem:[%s1020_s2] sm:$0xff]  ;;  %701 = vset.pattern.permute.xlu0 %v816_v8  ;;  %v376_v45 = vld [vmem:[#allocation2 + $0x8] sm:$0xff]  ;;  %v377_v48 = vld [vmem:[#allocation2 + $0x10] sm:$0xff]  ;;  %v817_v62 = vmov (!%p597_p1), 0.0   ;;  %vm818_vm4 = vmmov (!%p597_p1), 0   ;;  %vm443_vm5 = vcmask (!%p597_p1), 261120  }
  0x23   : > { %624 = vmatprep.subr.msk.bf16.mxu0 %vm302_vm1, %v264_v3  ;;  %v304_v6 = vsel %vm302_vm1, %v264_v3, 0  ;;  %702 = vset.pattern.permute.xlu1 %v816_v8  ;;  %v375_v43 = vld [vmem:[#allocation2] sm:$0xff]  ;;  %v378_v52 = vld [vmem:[#allocation2 + $0x18] sm:$0xff]  ;;  %v714_v2 = vld [vmem:[%s1021_s3 + $0x8] sm:$0xff] (!%p597_p1)   ;;  %vm487_vm6 = vcmask (!%p597_p1), 57344  }
  0x24   : > { %611 = vmatpush3.bf16.msra.mxu0 %v304_v6  ;;  %267 = vperm.xlu0 %701, %v259_v4   ;;  %v713_v0 = vld [vmem:[%s1021_s3] sm:$0xff] (!%p597_p1)  }
  0x25   : > { %277 = vperm.xlu1 %702, %v261_v5   ;;  %616 = vmatprep.subr.bf16.mxu0 (!%p597_p1), %v817_v62  ;;  %v404_v5 = vld [vmem:[%s1022_s4] sm:$0x1] (!%p597_p1) }
  0x27   : > { %613 = vmatmul.mubr.msk.bf16.vlgmr.msra.gmra.mrb[0].mxu0 %vm295_vm2, %v704_v7 }
  0x28   : > { %272 = vperm.xlu0 %701, %v260_v9   ;;  %620 = vmatprep.mubr.msk.bf16.mxu0 (!%p597_p1), %vm818_vm4, %v817_v62 }
  0x29   : > { %282 = vperm.xlu1 %702, %v262_v10   ;;  %617 = vmatpush3.bf16.msra.mxu0 (!%p597_p1), %v713_v0 }
  0x2a   : > { %618 = vmatprep.subr.bf16.mxu0 (!%p597_p1), %v817_v62 }
  0x2d   : > { %619 = vmatpush3.bf16.msra.mxu0 (!%p597_p1), %v714_v2 }
  0xa3   : > { %v268_v12 = vpop.permute.xlu0 %267 }
  0xa4   : > { %v278_v11 = vpop.permute.xlu1 %277 }
  0xa7   : > { %v273_v20 = vpop.permute.xlu0 %272 }
  0xa8   : > { %v283_v14 = vpop.permute.xlu1 %282 }
  0xfa   : > { %v614_v13 = vpop.f32.mrb[0].mxu0 }
  0xfb   : > { %v349_v15 = vadd.f32 %v614_v13, %v278_v11  ;;  %v340_v16 = vpop.f32.mrb[1].mxu0 }
  0xfc   : > { %v341_v17 = vadd.f32 %v340_v16, %v268_v12  ;;  %v615_v18 = vpop.f32.mrb[2].mxu0 }
  0xfd   : > { %v357_v19 = vmul.f32 0.5, %v349_v15  ;;  %v352_v21 = vadd.f32 %v615_v18, %v283_v14  ;;  %v343_v22 = vpop.f32.mrb[3].mxu0 }
  0xfe   : > { %v355_v23 = vmul.f32 0.5, %v341_v17  ;;  %v344_v24 = vadd.f32 %v343_v22, %v273_v20 }
  0xff   : > { %705 = vtanh.f32 %v357_v19  ;;  %v358_v25 = vmul.f32 0.5, %v352_v21 }
 0x100   : > { %707 = vtanh.f32 %v355_v23  ;;  %v356_v26 = vmul.f32 0.5, %v344_v24 }
 0x101   : > { %709 = vtanh.f32 %v358_v25 }
 0x102   : > { %711 = vtanh.f32 %v356_v26 }
 0x109   : > { %v706_v27 = vpop.eup %705 }
 0x10a   : > { %v708_v28 = vpop.eup %707  ;;  %v365_v31 = vmul.f32 0.5, %v706_v27 }
 0x10b   : > { %v710_v29 = vpop.eup %709  ;;  %v363_v30 = vmul.f32 0.5, %v708_v28 }
 0x10c   : > { %v712_v32 = vpop.eup %711  ;;  %v369_v37 = vadd.f32 0.5, %v365_v31  ;;  %v366_v38 = vmul.f32 0.5, %v710_v29 }
 0x10d   : > { %v367_v33 = vadd.f32 0.5, %v363_v30  ;;  %v364_v34 = vmul.f32 0.5, %v712_v32 }
 0x10e   : > { %v373_v40 = vmul.f32 %v369_v37, %v349_v15  ;;  %v370_v41 = vadd.f32 0.5, %v366_v38 }
 0x10f   : > { %v371_v35 = vmul.f32 %v367_v33, %v341_v17  ;;  %v368_v36 = vadd.f32 0.5, %v364_v34 }
 0x110   : > { %v374_v42 = vmul.f32 %v370_v41, %v352_v21 }
 0x111   : > { %379 = vadd.xlane.f32.xlu0 %v371_v35  ;;  %v372_v39 = vmul.f32 %v368_v36, %v344_v24 }
 0x113   : > { %381 = vadd.xlane.f32.xlu1 %v372_v39 }
 0x115   : > { %383 = vadd.xlane.f32.xlu0 %v373_v40 }
 0x119   : > { %385 = vadd.xlane.f32.xlu0 %v374_v42 }
 0x19e   : > { %v380_v44 = vpop.xlane.xlu0 %379 }
 0x19f   : > { %v387_v46 = vadd.f32 %v380_v44, %v375_v43 }
 0x1a0   : > { %v382_v47 = vpop.xlane.xlu1 %381 }
 0x1a1   : > { %392 = vst.msk [vmem:[#allocation2] sm:$0xff] %vm391_vm3, %v387_v46  ;;  %v388_v49 = vadd.f32 %v382_v47, %v376_v45 }
 0x1a2   : > { %v384_v50 = vpop.xlane.xlu0 %383 }
 0x1a3   : > { %393 = vst.msk [vmem:[#allocation2 + $0x8] sm:$0xff] %vm391_vm3, %v388_v49  ;;  %v389_v51 = vadd.f32 %v384_v50, %v377_v48  ;;  %399 = sbr.rel (%p597_p1) target bundleno = 1065 (0x429), region = 48 }
 0x1a5   : > { %394 = vst.msk [vmem:[#allocation2 + $0x10] sm:$0xff] %vm391_vm3, %v389_v51 }
 0x1a6   : > { %v386_v53 = vpop.xlane.xlu0 %385 }
 0x1a7   : > { %v390_v54 = vadd.f32 %v386_v53, %v378_v52 }
 0x1a8   : > { %v405_v55 = vld [vmem:[#allocation2] sm:$0xff] (!%p597_p1) }
 0x1a9   : > { %395 = vst.msk [vmem:[#allocation2 + $0x18] sm:$0xff] %vm391_vm3, %v390_v54  ;;  %v409_v58 = vmul.f32 (!%p597_p1), 0.00390625, %v405_v55 }
 0x1aa   : > { %v406_v56 = vld [vmem:[#allocation2 + $0x8] sm:$0xff] }
 0x1ab   : > { %v410_v59 = vmul.f32 0.00390625, %v406_v56 }
 0x1ac   : > { %v407_v57 = vld [vmem:[#allocation2 + $0x10] sm:$0xff] }
 0x1ad   : > { %v411_v61 = vmul.f32 0.00390625, %v407_v57  ;;  %v413_v1 = vpack.c.bf16 %v410_v59, %v409_v58 }
 0x1af   : > { %415 = vxpose.xlu0.c.b16.start [1/2] (short) (narrow) %v413_v1, 16 }
 0x1b0   : > { %v408_v60 = vld [vmem:[#allocation2 + $0x18] sm:$0xff] }
 0x1b1   : > { %v412_v63 = vmul.f32 0.00390625, %v408_v60 }
 0x1b3   : > { %v414_v3 = vpack.c.bf16 %v412_v63, %v411_v61 }
 0x1b5   : > { %416 = vxpose.xlu0.c.b16.end [2/2] (short) (narrow) %v414_v3, 16 }
 0x217   : > { %v423_v4 = vpop.trf.xlu0 }
 0x218   : > { %621 = vmatmul.mubr.msk.bf16.vlgmr.msra.gmra.mrb[0].mxu0 %vm443_vm5, %v423_v4 }
 0x2eb   : > { %v481_v6 = vpop.f32.mrb[0].mxu0 }
 0x2ec   : > { %v482_v7 = vadd.f32 %v481_v6, %v404_v5  ;;  %v622_v8 = vpop.f32.mrb[1].mxu0 }
 0x2ed   : > { %v484_v9 = vpop.f32.mrb[2].mxu0 }
 0x2ee   : > { %v623_v10 = vpop.f32.mrb[3].mxu0  ;;  %v488_v11 = vsel %vm487_vm6, %v482_v7, -inf }
 0x2ef   : > { %489 = vmax.xlane.f32.xlu1 %v488_v11 }
 0x37c   : > { %v490_v12 = vpop.xlane.xlu1 %489 }
 0x37d   : > { %v491_v13 = vsub.f32 %v482_v7, %v490_v12 }
 0x37f   : > { %v492_v14 = vmul.f32 1.442695, %v491_v13 }
 0x381   : > { %715 = vpow2.f32 %v492_v14 }
 0x38b   : > { %v716_v15 = vpop.eup %715 }
 0x38c   : > { %v494_v16 = vsel %vm487_vm6, %v716_v15, 0.0 }
 0x38d   : > { %495 = vadd.xlane.f32.xlu1 %v494_v16 }
 0x41a   : > { %v496_v17 = vpop.xlane.xlu1 %495 }
 0x41b   : > { %717 = vrcp.f32 %v496_v17 }
 0x425   : > { %v718_v18 = vpop.eup %717 }
 0x426   : > { %v498_v19 = vmul.f32 %v718_v18, %v716_v15 }
 0x428   : > { %499 = vst.msk [vmem:[%s929_s27] sm:$0x1] %vm487_vm6, %v498_v19 }
 0x429 PF: > { %s601_s16 = sshll.u32 %s801_s22, 4  ;;  %s513_s8 = sshll.u32 %s929_s27, 4  ;;  %s514_s8 = int_to_ptr.vmem [resolvable:$true] %s513_s8 }
 0x42a   : > { %s968_s7 = scalar_lea.hbm %s1023_s5, %s601_s16  ;;  %s501_s11 = scalar_lea.sflag [#allocation4], %s235_s10 }
 0x42b   : > { %s719_s12 = scalar_lea.vmem %s514_s8, 16  ;;  %s819_s21 = smov [#allocation3]  }
 0x42c   : > { %p720_p2 = scmp.ne.s32.totalorder %s514_s8, %s719_s12  ;;  %s723_s13 = sshll.u32 %s819_s21, 4  ;;  %s724_s13 = int_to_ptr.vmem [resolvable:$false] %s723_s13 }
 0x42d   : > { %s725_s14 = scalar_lea.vmem %s724_s13, 32  ;;  %p726_p6 = scmp.lt.s32.totalorder %s514_s8, %s724_s13 }
 0x42e   : > { %p721_p4 = pnand %p720_p2, %p899_p3  ;;  %p727_p7 = scmp.lt.s32.totalorder %s725_s14, %s719_s12 }
 0x430   : > { %p722_p5 = pneg %p721_p4  ;;  %p728_p8 = por %p727_p7, %p726_p6 }
 0x432   : > { %p729_p10 = pnand %p728_p8, %p722_p5 }
 0x434   : > { %732 = shalt.err (!%p729_p10)
}
 0x435   : > { %s733_s22 = scalar_lea.hbm %s968_s7, 16  ;;  %s737_s15 = scalar_lea.hbm %s1023_s5, 32 }
 0x436   : > { %p734_p11 = scmp.ne.s32.totalorder %s968_s7, %s733_s22  ;;  %p738_p0 = scmp.lt.u32.totalorder %s968_s7, %s1023_s5 }
 0x437   : > { %p739_p1 = scmp.lt.u32.totalorder %s737_s15, %s733_s22  ;;  %p741_p4 = scmp.lt.u32.totalorder %s733_s22, %s968_s7 }
 0x438   : > { %p735_p12 = pnand %p734_p11, %p899_p3 }
 0x439   : > { %p740_p2 = por %p739_p1, %p738_p0 }
 0x43a   : > { %p736_p13 = pneg %p735_p12 }
 0x43b   : > { %p742_p5 = por %p741_p4, %p740_p2 }
 0x43d   : > { %p743_p6 = pnand %p742_p5, %p736_p13 }
 0x43f   : > { %746 = shalt.err (!%p743_p6)
}
 0x440   : > { %625 = dma.vmem_to_hbm [thread:$0]  (%p899_p3), %s514_s8, 16, %s968_s7, %s501_s11  }
 0x441 PF: > { %p631_p7 = scmp.ge.s32.totalorder %s813_s25, 2  ;;  %s525_s26 = sand.u32 1, %s785_s18  }
 0x442   : > { %s526_s12 = scalar_lea.sflag [#allocation4], %s525_s26 }
 0x443   : > { %p628_p8 = pnand %p631_p7, %p909_p9 }
 0x445   : > { %780 = dma.done.wait (!%p628_p8), %s526_s12, 16  }
 0x446   : > { %782 = vsyncadd (!%p628_p8), %s526_s12, 4294967280  ;;  %s18_s25 = sadd.s32 1, %s813_s25   ;;  %s1026_s18 = smov %s789_s19 }
 0x447   : > { %p15_p10 = scmp.ge.s32.totalorder %s18_s25, 6   ;;  %s1027_s19 = smov %s793_s20 }
 0x448   : > { %s1028_s20 = smov %s917_s9  ;;  %s1029_s21 = smov %s805_s23 }
 0x449   : > { %s1030_s22 = smov %s809_s24  ;;  %s1031_s23 = smov %s1034_s28 }
 0x44a   : > { %s1032_s24 = smov %s1038_s29  ;;  %17 = sbr.rel (!%p15_p10) target bundleno = 5 (0x5), region = 83 }
 0x451   :  { %530 = vsyncpa [#allocation4], 1 }
 0x452   :  { %532 = vsyncpa [#allocation4 + $0x1], 1 }

</bundles_post_ra>
